<compile_context>
chip_gen: v7x
topology: tpu7x:2x2x1
jax: 0.10.0
libtpu: 0.0.40
codegen_flags: <defaults>
</compile_context>

<pallas_src>
import functools

import jax
import jax.numpy as jnp
from jax.experimental import pallas as pl
from jax.experimental.pallas import tpu as pltpu

_LANE = 128
_SUBLANE = 8


def _ceil_to(x, m):
    return ((x + m - 1) // m) * m


def _cdiv(a, b):
    return (a + b - 1) // b


def _tpu_tuning():
    """Per-generation tile target bytes / scoped-VMEM limit / TensorCore count."""
    try:
        kind = jax.devices()[0].device_kind.lower()
    except Exception:
        kind = ""
    if "v7" in kind or "tpu7" in kind:
        # 6 MiB tiles: 2 inputs x 2 buffers x 6 MiB = 24 MiB << 48 MiB limit (64 MiB phys).
        return {"tile_bytes": 6 << 20, "vmem_limit": 48 << 20, "cores": 2}
    if "v6" in kind:
        # 4 MiB tiles: 16 MiB resident, within the 32 MiB default scoped VMEM.
        return {"tile_bytes": 4 << 20, "vmem_limit": None, "cores": 1}
    # v5e / unknown: stay inside the 16 MiB default scoped VMEM.
    return {"tile_bytes": 2 << 20, "vmem_limit": None, "cores": 1}


def _choose_tiles(batch, feat, itemsize, target_bytes):
    """Pick (tile_rows, tile_cols) so one input tile is ~target_bytes of (padded) VMEM."""
    row_bytes = _ceil_to(feat, _LANE) * itemsize            # lane-padded row bytes
    if _ceil_to(batch, _SUBLANE) * row_bytes <= target_bytes:
        return batch, feat                                   # whole input in one tile
    tb = target_bytes // row_bytes
    if tb >= batch:
        return batch, feat
    if tb >= _LANE:
        return (tb // _LANE) * _LANE, feat                   # full-D rows, 128-row aligned
    # Rows too wide even for 128-row tiles: tile the feature dim as well.
    tb = batch if batch <= _LANE else _LANE
    td = target_bytes // (_ceil_to(tb, _SUBLANE) * itemsize)
    td = max(_LANE, (td // _LANE) * _LANE)
    if td >= feat:
        return tb, feat
    return tb, td


def _legal_rows(tb, batch):
    tb = int(tb)
    if tb >= batch:
        return batch
    return max(_LANE, (tb // _LANE) * _LANE)


def _legal_cols(td, feat):
    td = int(td)
    if td >= feat:
        return feat
    return max(_LANE, (td // _LANE) * _LANE)


def _contrastive_kernel(x1_ref, x2_ref, y_ref, out_ref, acc_ref, *dsq_scratch,
                        margin, batch, feat, tile_rows, tile_cols,
                        tiles_per_core, num_d_tiles, full_tiles,
                        needs_row_mask, d_ragged):
    c = pl.program_id(0)          # TensorCore (parallel axis)
    i = pl.program_id(1)          # batch tile within this core
    k = pl.program_id(2)          # feature chunk

    @pl.when(jnp.logical_and(i == 0, k == 0))
    def _():
        acc_ref[...] = jnp.zeros_like(acc_ref)

    diff = x1_ref[...].astype(jnp.float32) - x2_ref[...].astype(jnp.float32)

    def finalize(dsq):
        # dsq: (tile_rows, 1) f32.  Per-row loss terms, then contract the row axis
        # against the lane-dense (1, tile_rows) labels with two tiny MXU dots
        # (full f32 precision) -> (1, 1) tile contribution.  Avoids any
        # sublane<->lane relayout of the per-row vectors.
        dist = jnp.sqrt(dsq)
        mdist = jnp.maximum(margin - dist, 0.0)
        mdist2 = mdist * mdist
        y_row = y_ref[...].astype(jnp.float32)               # (1, tile_rows)

        def accumulate(y_v, dsq_v, mdist2_v):
            acc_ref[...] += (
                jnp.dot(y_v, dsq_v,
                        precision=jax.lax.Precision.HIGHEST,
                        preferred_element_type=jnp.float32)
                + jnp.dot(1.0 - y_v, mdist2_v,
                          precision=jax.lax.Precision.HIGHEST,
                          preferred_element_type=jnp.float32))

        if needs_row_mask:
            t = c * tiles_per_core + i                       # global batch-tile index

            @pl.when(t < full_tiles)
            def _():
                accumulate(y_row, dsq, mdist2)

            @pl.when(t >= full_tiles)
            def _():
                # Edge tile: rows past the true batch hold unspecified VMEM padding.
                # Use selects (not multiplies) so NaN/Inf garbage can never leak.
                row = t * tile_rows + jax.lax.broadcasted_iota(
                    jnp.int32, dsq.shape, 0)
                col = t * tile_rows + jax.lax.broadcasted_iota(
                    jnp.int32, y_row.shape, 1)
                rvalid = row < batch
                accumulate(jnp.where(col < batch, y_row, 0.0),
                           jnp.where(rvalid, dsq, 0.0),
                           jnp.where(rvalid, mdist2, 0.0))
        else:
            accumulate(y_row, dsq, mdist2)

    if num_d_tiles == 1:
        finalize(jnp.sum(diff * diff, axis=1, keepdims=True))
    else:
        dsq_acc, = dsq_scratch

        @pl.when(k == 0)
        def _():
            dsq_acc[...] = jnp.zeros_like(dsq_acc)

        @pl.when(k < num_d_tiles - 1)
        def _():
            dsq_acc[...] += jnp.sum(diff * diff, axis=1, keepdims=True)

        @pl.when(k == num_d_tiles - 1)
        def _():
            d2 = diff * diff
            if d_ragged:
                colg = (num_d_tiles - 1) * tile_cols + jax.lax.broadcasted_iota(
                    jnp.int32, d2.shape, 1)
                d2 = jnp.where(colg < feat, d2, 0.0)         # mask ragged feature cols
            dsq_acc[...] += jnp.sum(d2, axis=1, keepdims=True)
            finalize(dsq_acc[...])

    @pl.when(jnp.logical_and(i == tiles_per_core - 1, k == num_d_tiles - 1))
    def _():
        out_ref[0, 0] = jnp.sum(acc_ref[...])                # per-core partial sum


def contrastive_loss(input1, input2, y, margin=1.0,
                     block_rows=None, block_cols=None):
    """Pallas TPU implementation of ContrastiveLoss.forward.

    input1, input2: (B, D) float arrays (any float dtype; upcast in-kernel)
    y:              (B,) or (B, 1) labels (any numeric dtype)
    returns scalar float32 loss
    """
    batch, feat = input1.shape
    margin = float(margin)

    y = jnp.asarray(y)
    if not jnp.issubdtype(y.dtype, jnp.floating):
        y = y.astype(jnp.float32)
    y_row = jnp.reshape(y, (1, batch))                        # lane-dense labels

    tuning = _tpu_tuning()
    itemsize = jnp.dtype(input1.dtype).itemsize
    tb, td = _choose_tiles(batch, feat, itemsize, tuning["tile_bytes"])
    if block_rows is not None:
        tb = _legal_rows(block_rows, batch)
    if block_cols is not None:
        td = _legal_cols(block_cols, feat)

    num_b_tiles = _cdiv(batch, tb)
    num_d_tiles = _cdiv(feat, td)
    num_cores = min(tuning["cores"], num_b_tiles)
    tiles_per_core = _cdiv(num_b_tiles, num_cores)

    needs_row_mask = (num_cores * tiles_per_core * tb != batch)
    full_tiles = batch // tb                                  # tiles with no padded rows
    d_ragged = (num_d_tiles > 1) and (feat % td != 0)

    if num_cores * tiles_per_core == num_b_tiles:
        def tile_of(c, i):
            return c * tiles_per_core + i
    else:
        def tile_of(c, i):                                    # clamp grid-padding tiles
            return jnp.minimum(c * tiles_per_core + i, num_b_tiles - 1)

    kernel = functools.partial(
        _contrastive_kernel,
        margin=margin, batch=batch, feat=feat,
        tile_rows=tb, tile_cols=td,
        tiles_per_core=tiles_per_core, num_d_tiles=num_d_tiles,
        full_tiles=full_tiles, needs_row_mask=needs_row_mask,
        d_ragged=d_ragged)

    scratch_shapes = [pltpu.VMEM((1, 1), jnp.float32)]        # per-core loss accumulator
    if num_d_tiles > 1:
        scratch_shapes.append(pltpu.VMEM((tb, 1), jnp.float32))  # partial dsq over D

    cp_kwargs = {"dimension_semantics": ("parallel", "arbitrary", "arbitrary")}
    if tuning["vmem_limit"] is not None:
        cp_kwargs["vmem_limit_bytes"] = tuning["vmem_limit"]

    partials = pl.pallas_call(
        kernel,
        out_shape=jax.ShapeDtypeStruct((num_cores, 1), jnp.float32),
        grid_spec=pltpu.PrefetchScalarGridSpec(
            num_scalar_prefetch=0,
            grid=(num_cores, tiles_per_core, num_d_tiles),
            in_specs=[
                pl.BlockSpec((tb, td), lambda c, i, k: (tile_of(c, i), k)),
                pl.BlockSpec((tb, td), lambda c, i, k: (tile_of(c, i), k)),
                pl.BlockSpec((1, tb), lambda c, i, k: (0, tile_of(c, i))),
            ],
            out_specs=pl.BlockSpec((1, 1), lambda c, i, k: (c, 0),
                                   memory_space=pltpu.SMEM),
            scratch_shapes=scratch_shapes,
        ),
        compiler_params=pltpu.CompilerParams(**cp_kwargs),
    )(input1, input2, y_row)

    # Mirror the reference's  sum(...) / 2.0 / B  exactly.
    return jnp.sum(partials) / 2.0 / batch


def contrastive_loss_ref(input1, input2, y, margin=1.0):
    """Pure-JAX reference, mirrors the PyTorch forward exactly."""
    diff = input1.astype(jnp.float32) - input2.astype(jnp.float32)
    dsq = jnp.sum(diff ** 2, axis=1)
    dist = jnp.sqrt(dsq)
    mdist = jnp.maximum(margin - dist, 0.0)
    yf = y.astype(jnp.float32).reshape(-1)
    loss = yf * dsq + (1.0 - yf) * mdist ** 2
    return jnp.sum(loss) / 2.0 / input1.shape[0]


if __name__ == "__main__":
    key = jax.random.PRNGKey(0)
    k1, k2, k3, k4, k5, k6, k7, k8, k9 = jax.random.split(key, 9)

    # 1) Module-typical small siamese embeddings -> single-tile path.
    B, D = 8, 32
    x1 = jax.random.normal(k1, (B, D), dtype=jnp.float32)
    x2 = jax.random.normal(k2, (B, D), dtype=jnp.float32)
    y = jax.random.bernoulli(k3, 0.5, (B,)).astype(jnp.float32)
    out = contrastive_loss(x1, x2, y, margin=1.0)
    jax.block_until_ready(out)
    ref = contrastive_loss_ref(x1, x2, y, margin=1.0)
    assert jnp.allclose(out, ref, rtol=1e-5, atol=1e-5), (out, ref)

    # 2) Batch-tiled path with a ragged (masked) last tile.
    B2, D2 = 200, 128
    x1b = jax.random.normal(k4, (B2, D2), dtype=jnp.float32)
    x2b = jax.random.normal(k5, (B2, D2), dtype=jnp.float32)
    yb = jax.random.bernoulli(k6, 0.5, (B2,)).astype(jnp.float32)
    out2 = contrastive_loss(x1b, x2b, yb, margin=1.0, block_rows=128)
    jax.block_until_ready(out2)
    ref2 = contrastive_loss_ref(x1b, x2b, yb, margin=1.0)
    assert jnp.allclose(out2, ref2, rtol=1e-5, atol=1e-5), (out2, ref2)

    # 3) Feature-tiled path (inner 'arbitrary' D axis, ragged last D chunk).
    B3, D3 = 24, 320
    x1c = jax.random.normal(k7, (B3, D3), dtype=jnp.float32)
    x2c = jax.random.normal(k8, (B3, D3), dtype=jnp.float32)
    yc = jax.random.bernoulli(k9, 0.5, (B3,)).astype(jnp.float32)
    out3 = contrastive_loss(x1c, x2c, yc, margin=1.0, block_cols=128)
    jax.block_until_ready(out3)
    ref3 = contrastive_loss_ref(x1c, x2c, yc, margin=1.0)
    assert jnp.allclose(out3, ref3, rtol=1e-5, atol=1e-5), (out3, ref3)

    print("KERNEL_OK")
</pallas_src>

<mosaic_0001>
module attributes {stable_mosaic.version = 11 : i64} {
  func.func @_contrastive_kernel(%arg0: i32, %arg1: i32, %arg2: i32, %arg3: memref<8x32xf32, #tpu.memory_space<vmem>>, %arg4: memref<8x32xf32, #tpu.memory_space<vmem>>, %arg5: memref<1x8xf32, #tpu.memory_space<vmem>>, %arg6: memref<1x1xf32, #tpu.memory_space<smem>>, %arg7: memref<1x1xf32, #tpu.memory_space<vmem>>) attributes {dimension_semantics = [#tpu.dimension_semantics<parallel>, #tpu.dimension_semantics<arbitrary>, #tpu.dimension_semantics<arbitrary>], iteration_bounds = array<i64: 1, 1, 1>, scalar_prefetch = 0 : i64, scratch_operands = 1 : i64, tpu.core_type = #tpu.core_type<tc>, window_params = [{transform_indices = @transform_0, window_bounds = array<i64: 8, 32>}, {transform_indices = @transform_1, window_bounds = array<i64: 8, 32>}, {transform_indices = @transform_2, window_bounds = array<i64: 1, 8>}, {transform_indices = @transform_3, window_bounds = array<i64: 1, 1>}]} {
    %c0_i32 = arith.constant 0 : i32
    %0 = arith.cmpi eq, %arg1, %c0_i32 : i32
    %c0_i32_0 = arith.constant 0 : i32
    %1 = arith.cmpi eq, %arg2, %c0_i32_0 : i32
    %2 = arith.andi %0, %1 : i1
    %3 = arith.extui %2 : i1 to i32
    %c0_i32_1 = arith.constant 0 : i32
    %4 = arith.cmpi ne, %3, %c0_i32_1 : i32
    scf.if %4 {
      %cst_19 = arith.constant 0.000000e+00 : f32
      %31 = vector.broadcast %cst_19 : f32 to vector<1x1xf32>
      %c0_20 = arith.constant 0 : index
      %c0_21 = arith.constant 0 : index
      %32 = vector.load %arg7[%c0_20, %c0_21] : memref<1x1xf32, #tpu.memory_space<vmem>>, vector<1x1xf32>
      tpu.vector_store %arg7[%c0_20, %c0_21], %31 {strides = array<i32>} : memref<1x1xf32, #tpu.memory_space<vmem>>, vector<1x1xf32>,
    } else {
    }
    %c0 = arith.constant 0 : index
    %c0_2 = arith.constant 0 : index
    %5 = vector.load %arg3[%c0, %c0_2] : memref<8x32xf32, #tpu.memory_space<vmem>>, vector<8x32xf32>
    %c0_3 = arith.constant 0 : index
    %c0_4 = arith.constant 0 : index
    %6 = vector.load %arg4[%c0_3, %c0_4] : memref<8x32xf32, #tpu.memory_space<vmem>>, vector<8x32xf32>
    %7 = arith.subf %5, %6 : vector<8x32xf32>
    %8 = arith.mulf %7, %7 : vector<8x32xf32>
    %cst = arith.constant dense<0.000000e+00> : vector<8xf32>
    %9 = vector.multi_reduction <add>, %8, %cst [1] : vector<8x32xf32> to vector<8xf32>
    %10 = vector.shape_cast %9 : vector<8xf32> to vector<8x1xf32>
    %11 = math.sqrt %10 : vector<8x1xf32>
    %cst_5 = arith.constant 1.000000e+00 : f32
    %12 = vector.broadcast %cst_5 : f32 to vector<8x1xf32>
    %13 = arith.subf %12, %11 : vector<8x1xf32>
    %cst_6 = arith.constant 0.000000e+00 : f32
    %14 = vector.broadcast %cst_6 : f32 to vector<8x1xf32>
    %15 = arith.maximumf %13, %14 : vector<8x1xf32>
    %16 = arith.mulf %15, %15 : vector<8x1xf32>
    %c0_7 = arith.constant 0 : index
    %c0_8 = arith.constant 0 : index
    %17 = vector.load %arg5[%c0_7, %c0_8] : memref<1x8xf32, #tpu.memory_space<vmem>>, vector<1x8xf32>
    %c0_9 = arith.constant 0 : index
    %c0_10 = arith.constant 0 : index
    %18 = vector.load %arg7[%c0_9, %c0_10] : memref<1x1xf32, #tpu.memory_space<vmem>>, vector<1x1xf32>
    %cst_11 = arith.constant dense<0.000000e+00> : vector<1x1xf32>
    %19 = tpu.matmul %17, %10, %cst_11 {dimension_numbers = #tpu.dot_dimension_numbers<[1], [0], [0], [1], [0, 0, 1, 1], [], []>, precision = #tpu.contract_precision<fp32>} : vector<1x8xf32>, vector<8x1xf32>, vector<1x1xf32> -> vector<1x1xf32>
    %cst_12 = arith.constant 1.000000e+00 : f32
    %20 = vector.broadcast %cst_12 : f32 to vector<1x8xf32>
    %21 = arith.subf %20, %17 : vector<1x8xf32>
    %cst_13 = arith.constant dense<0.000000e+00> : vector<1x1xf32>
    %22 = tpu.matmul %21, %16, %cst_13 {dimension_numbers = #tpu.dot_dimension_numbers<[1], [0], [0], [1], [0, 0, 1, 1], [], []>, precision = #tpu.contract_precision<fp32>} : vector<1x8xf32>, vector<8x1xf32>, vector<1x1xf32> -> vector<1x1xf32>
    %23 = arith.addf %19, %22 : vector<1x1xf32>
    %24 = arith.addf %18, %23 : vector<1x1xf32>
    %c0_14 = arith.constant 0 : index
    %c0_15 = arith.constant 0 : index
    %25 = vector.load %arg7[%c0_14, %c0_15] : memref<1x1xf32, #tpu.memory_space<vmem>>, vector<1x1xf32>
    tpu.vector_store %arg7[%c0_14, %c0_15], %24 {strides = array<i32>} : memref<1x1xf32, #tpu.memory_space<vmem>>, vector<1x1xf32>,
    %c0_i32_16 = arith.constant 0 : i32
    %26 = arith.cmpi eq, %arg1, %c0_i32_16 : i32
    %c0_i32_17 = arith.constant 0 : i32
    %27 = arith.cmpi eq, %arg2, %c0_i32_17 : i32
    %28 = arith.andi %26, %27 : i1
    %29 = arith.extui %28 : i1 to i32
    %c0_i32_18 = arith.constant 0 : i32
    %30 = arith.cmpi ne, %29, %c0_i32_18 : i32
    scf.if %30 {
      %c0_19 = arith.constant 0 : index
      %c0_20 = arith.constant 0 : index
      %31 = vector.load %arg7[%c0_19, %c0_20] : memref<1x1xf32, #tpu.memory_space<vmem>>, vector<1x1xf32>
      %32 = vector.shape_cast %31 : vector<1x1xf32> to vector<1x1x1xf32>
      %cst_21 = arith.constant dense<0.000000e+00> : vector<1xf32>
      %33 = vector.multi_reduction <add>, %32, %cst_21 [1, 2] : vector<1x1x1xf32> to vector<1xf32>
      %34 = vector.shape_cast %33 : vector<1xf32> to vector<1x1x1xf32>
      %35 = vector.extract %34[0, 0, 0] : f32 from vector<1x1x1xf32>
      %c0_22 = arith.constant 0 : index
      %c0_23 = arith.constant 0 : index
      %36 = memref.load %arg6[%c0_22, %c0_23] : memref<1x1xf32, #tpu.memory_space<smem>>
      memref.store %35, %arg6[%c0_22, %c0_23] : memref<1x1xf32, #tpu.memory_space<smem>>
    } else {
    }
    return
  }
  func.func @transform_0(%arg0: i32, %arg1: i32, %arg2: i32) -> (i32, i32) {
    %c1_i32 = arith.constant 1 : i32
    %0 = arith.muli %arg0, %c1_i32 : i32
    %1 = arith.addi %0, %arg1 : i32
    %c0_i32 = arith.constant 0 : i32
    return %1, %arg2 : i32, i32
  }
  func.func @transform_1(%arg0: i32, %arg1: i32, %arg2: i32) -> (i32, i32) {
    %c1_i32 = arith.constant 1 : i32
    %0 = arith.muli %arg0, %c1_i32 : i32
    %1 = arith.addi %0, %arg1 : i32
    %c0_i32 = arith.constant 0 : i32
    return %1, %arg2 : i32, i32
  }
  func.func @transform_2(%arg0: i32, %arg1: i32, %arg2: i32) -> (i32, i32) {
    %c1_i32 = arith.constant 1 : i32
    %0 = arith.muli %arg0, %c1_i32 : i32
    %1 = arith.addi %0, %arg1 : i32
    %c0_i32 = arith.constant 0 : i32
    %c0_i32_0 = arith.constant 0 : i32
    return %c0_i32, %1 : i32, i32
  }
  func.func @transform_3(%arg0: i32, %arg1: i32, %arg2: i32) -> (i32, i32) {
    %c0_i32 = arith.constant 0 : i32
    %c0_i32_0 = arith.constant 0 : i32
    return %arg0, %c0_i32 : i32, i32
  }
}

</mosaic_0001>

<bundles_post_ra>
// kernel: tpu_custom_call.1
= control target key start
LH: loop header
LB: loop body
LE: loop exit
PB: predicated region body
PF: predicated region fallthrough
CT: control target
= control target key end

     0   :  { %8 = vsyncpa [#allocation4], 0  ;;  %s1273_s0 = inlined_call_operand.hbm [shape: f32[8,32], index: 0, kind: input, shape index: {}]   ;;  %s1274_s1 = inlined_call_operand.hbm [shape: f32[8,32], index: 1, kind: input, shape index: {}]   ;;  %s1275_s2 = inlined_call_operand.vmem [shape: f32[1,8], index: 2, kind: input, shape index: {}]   ;;  %s1276_s3 = inlined_call_operand.hbm [shape: f32[1,1], index: 3, kind: output, shape index: {}]  }
   0x1   :  { %9 = vsyncpa [#allocation7], 0 }
   0x2   :  { %10 = vsyncpa [#allocation5], 0  ;;  %s1170_s12 = smov [#allocation3]   ;;  %s1171_s14 = smov [#allocation6]  }
   0x3   :  { %s20_s13 = sshll.u32 %s1170_s12, 4  ;;  %s33_s15 = sshll.u32 %s1171_s14, 4  ;;  %s21_s13 = int_to_ptr.vmem [resolvable:$true] %s20_s13  ;;  %s34_s15 = int_to_ptr.vmem [resolvable:$true] %s33_s15 }
   0x4   :  { %s1110_s18 = scalar_lea.hbm %s1273_s0, 128 }
   0x5   :  { %p1111_p0 = scmp.ne.s32.totalorder %s1273_s0, %s1110_s18  ;;  %p1114_p1 = scmp.lt.u32.totalorder %s1110_s18, %s1273_s0 }
   0x7   :  { %p1116_p2 = pnand %p1114_p1, %p1111_p0 }
   0x9   :  { %1119 = shalt.err (!%p1116_p2)
}
   0xa   :  { %s1120_s23 = scalar_lea.vmem %s21_s13, 128  ;;  %p1125_p4 = scmp.lt.s32.totalorder %s21_s13, %s21_s13 }
   0xb   :  { %p1121_p3 = scmp.ne.s32.totalorder %s21_s13, %s1120_s23  ;;  %p1126_p5 = scmp.lt.s32.totalorder %s1120_s23, %s1120_s23 }
   0xd   :  { %p1127_p6 = por %p1126_p5, %p1125_p4 }
   0xf   :  { %p1128_p7 = pnand %p1127_p6, %p1121_p3 }
  0x11   :  { %1131 = shalt.err (!%p1128_p7)
}
  0x12   :  { %23 = dma.hbm_to_vmem [thread:$0]  %s1273_s0, 128, %s21_s13, [#allocation4]  }
  0x13   :  { %s1132_s28 = scalar_lea.hbm %s1274_s1, 128 }
  0x14   :  { %p1133_p8 = scmp.ne.s32.totalorder %s1274_s1, %s1132_s28  ;;  %p1136_p9 = scmp.lt.u32.totalorder %s1132_s28, %s1274_s1 }
  0x16   :  { %p1138_p10 = pnand %p1136_p9, %p1133_p8 }
  0x18   :  { %1141 = shalt.err (!%p1138_p10)
}
  0x19   :  { %s1142_s6 = scalar_lea.vmem %s34_s15, 128  ;;  %p1147_p12 = scmp.lt.s32.totalorder %s34_s15, %s34_s15 }
  0x1a   :  { %p1143_p11 = scmp.ne.s32.totalorder %s34_s15, %s1142_s6  ;;  %p1148_p13 = scmp.lt.s32.totalorder %s1142_s6, %s1142_s6 }
  0x1c   :  { %p1149_p0 = por %p1148_p13, %p1147_p12 }
  0x1e   :  { %p1150_p1 = pnand %p1149_p0, %p1143_p11 }
  0x20   :  { %1153 = shalt.err (!%p1150_p1)
}
  0x21   :  { %36 = dma.hbm_to_vmem [thread:$0]  %s1274_s1, 128, %s34_s15, [#allocation7]  }
  0x22   :  { %1164 = dma.done.wait [#allocation4], 128  }
  0x23   :  { %1165 = vsyncadd [#allocation4], 4294967168 }
  0x24   :  { %1166 = dma.done.wait [#allocation7], 128  }
  0x25   :  { %1167 = vsyncadd [#allocation7], 4294967168  ;;  %v69_v0 = vld [vmem:[#allocation3] sm:$0xff]  ;;  %v70_v1 = vld [vmem:[#allocation6] sm:$0xff]  ;;  %vm73_vm0 = vcmask 261120   ;;  %v1172_v5 = vmov 0.0  }
  0x26   :  { %v71_v2 = vsub.f32 %v69_v0, %v70_v1  ;;  %1041 = vmatprep.subr.mxu0 %v1172_v5  ;;  %1046 = vmatprep.subr.mxu1 %v1172_v5  ;;  %vm1173_vm1 = vmmov 0   ;;  %v87_v6 = vld [vmem:[%s1275_s2] sm:$0x1]  ;;  %vm90_vm2 = vcmask 64512   ;;  %vm67_vm5 = vcmask 0   ;;  %s1154_s11 = scalar_lea.hbm %s1276_s3, 16 }
  0x27   :  { %1043 = vmatprep.mubr.msk.f32.mxu0 %vm1173_vm1, %v1172_v5  ;;  %1048 = vmatprep.mubr.msk.f32.mxu1 %vm1173_vm1, %v1172_v5  ;;  %v89_v7 = vsub.f32 1.0, %v87_v6  ;;  %v541_v18 = vsel %vm90_vm2, %v87_v6, 0  ;;  %68 = vst.msk [vmem:[#allocation2] sm:$0x1] %vm67_vm5, %v1172_v5  ;;  %p1155_p2 = scmp.ne.s32.totalorder %s1276_s3, %s1154_s11  ;;  %p1158_p3 = scmp.lt.u32.totalorder %s1154_s11, %s1276_s3 }
  0x28   :  { %v72_v3 = vmul.f32 %v71_v2, %v71_v2  ;;  %v609_v22 = vand.u32 4294901760, %v541_v18 }
  0x29   :  { %v92_v9 = vsel %vm90_vm2, %v89_v7, 0  ;;  %p1160_p4 = pnand %p1158_p3, %p1155_p2 }
  0x2a   :  { %v74_v4 = vsel %vm73_vm0, %v72_v3, 0.0  ;;  %v160_v10 = vand.u32 4294901760, %v92_v9  ;;  %v610_v26 = vsub.f32 %v541_v18, %v609_v22 }
  0x2b   :  { %75 = vadd.xlane.f32.xlu0 %v74_v4 }
  0x2c   :  { %v161_v11 = vsub.f32 %v92_v9, %v160_v10  ;;  %v611_v30 = vand.u32 4294901760, %v610_v26 }
  0x2e   :  { %v162_v15 = vand.u32 4294901760, %v161_v11  ;;  %v612_v34 = vsub.f32 %v610_v26, %v611_v30  ;;  %v88_v7 = vld [vmem:[#allocation2] sm:$0x1] }
  0x30   :  { %v163_v20 = vsub.f32 %v161_v11, %v162_v15  ;;  %v613_v36 = vand.u32 4294901760, %v612_v34 }
  0x32   :  { %v164_v24 = vand.u32 4294901760, %v163_v20 }
  0xb8   :  { %v76_v8 = vpop.xlane.xlu0 %75 }
  0xb9   :  { %1108 = vrsqrt.f32 %v76_v8  ;;  %vm79_vm3 = vcmp.eq.f32.partialorder %v76_v8, inf  ;;  %v82_v14 = vand.u32 2147483648, %v76_v8  ;;  %vm81_vm4 = vcmp.eq.f32.partialorder %v76_v8, 0.0 }
  0xba   :  { %v544_v28 = vand.u32 4294901760, %v76_v8 }
  0xbc   :  { %v621_v32 = vsub.f32 %v76_v8, %v544_v28 }
  0xbe   :  { %v622_v35 = vand.u32 4294901760, %v621_v32 }
  0xc0   :  { %v623_v37 = vsub.f32 %v621_v32, %v622_v35 }
  0xc2   :  { %v624_v38 = vand.u32 4294901760, %v623_v37 }
  0xc3   :  { %v1109_v12 = vpop.eup %1108 }
  0xc4   :  { %v78_v13 = vmul.f32 %v1109_v12, %v76_v8 }
  0xc6   :  { %v80_v16 = vsel %vm79_vm3, %v76_v8, %v78_v13 }
  0xc7   :  { %v83_v17 = vsel %vm81_vm4, %v82_v14, %v80_v16 }
  0xc8   :  { %v84_v19 = vsub.f32 1.0, %v83_v17 }
  0xca   :  { %v85_v21 = vmax.f32 %v84_v19, 0.0 }
  0xcc   :  { %v86_v23 = vmul.f32 %v85_v21, %v85_v21 }
  0xce   :  { %v95_v25 = vand.u32 4294901760, %v86_v23 }
  0xd0   :  { %1042 = vmatpush3.msra.mxu0 %v95_v25  ;;  %v172_v27 = vsub.f32 %v86_v23, %v95_v25 }
  0xd1   :  { %1044 = vmatmul.mubr.f32.vlgmr.msra.gmra.mrb[0].mxu0 %v164_v24  ;;  %1051 = vmatprep.subr.mxu0 %v1172_v5 }
  0xd2   :  { %1052 = vmatpush3.msra.mxu0 %v172_v27  ;;  %1053 = vmatprep.mubr.msk.f32.mxu0 %vm1173_vm1, %v1172_v5  ;;  %v173_v29 = vand.u32 4294901760, %v172_v27 }
  0xd3   :  { %1061 = vmatprep.subr.mxu0 %v1172_v5 }
  0xd4   :  { %v174_v31 = vsub.f32 %v172_v27, %v173_v29 }
  0xd5   :  { %1054 = vmatmul.mubr.f32.vlgmr.msra.gmra.mrb[2].mxu0 %v161_v11 }
  0xd6   :  { %1062 = vmatpush3.msra.mxu0 %v173_v29  ;;  %v175_v33 = vand.u32 4294901760, %v174_v31  ;;  %1063 = vmatprep.mubr.msk.f32.mxu0 %vm1173_vm1, %v1172_v5 }
  0xd7   :  { %1071 = vmatprep.subr.mxu0 %v1172_v5 }
  0xd8   :  { %1047 = vmatpush3.msra.mxu1 %v175_v33 }
  0xd9   :  { %1049 = vmatmul.mubr.f32.vlgmr.msra.gmra.mrb[0].mxu1 %v160_v10  ;;  %1056 = vmatprep.subr.mxu1 %v1172_v5 }
  0xda   :  { %1064 = vmatmul.mubr.f32.vlgmr.msra.gmra.mrb[4].mxu0 %v160_v10  ;;  %1057 = vmatpush3.msra.mxu1 %v95_v25 }
  0xdb   :  { %1072 = vmatpush3.msra.mxu0 %v544_v28  ;;  %1058 = vmatprep.mubr.msk.f32.mxu1 %vm1173_vm1, %v1172_v5 }
  0xdc   :  { %1066 = vmatprep.subr.mxu1 %v1172_v5  ;;  %1073 = vmatprep.mubr.msk.f32.mxu0 %vm1173_vm1, %v1172_v5 }
  0xdd   :  { %1081 = vmatprep.subr.mxu0 %v1172_v5  ;;  %1059 = vmatmul.mubr.f32.vlgmr.msra.gmra.mrb[2].mxu1 %v162_v15 }
  0xde   :  { %1067 = vmatpush3.msra.mxu1 %v95_v25  ;;  %1074 = vmatmul.mubr.f32.vlgmr.msra.gmra.mrb[6].mxu0 %v613_v36 }
  0xdf   :  { %1082 = vmatpush3.msra.mxu0 %v621_v32  ;;  %1068 = vmatprep.mubr.msk.f32.mxu1 %vm1173_vm1, %v1172_v5 }
  0xe0   :  { %1076 = vmatprep.subr.mxu1 %v1172_v5  ;;  %1083 = vmatprep.mubr.msk.f32.mxu0 %vm1173_vm1, %v1172_v5 }
  0xe1   :  { %1091 = vmatprep.subr.mxu0 %v1172_v5  ;;  %1069 = vmatmul.mubr.f32.vlgmr.msra.gmra.mrb[4].mxu1 %v160_v10 }
  0xe2   :  { %1077 = vmatpush3.msra.mxu1 %v624_v38  ;;  %1084 = vmatmul.mubr.f32.vlgmr.msra.gmra.mrb[8].mxu0 %v610_v26 }
  0xe3   :  { %1092 = vmatpush3.msra.mxu0 %v622_v35  ;;  %1078 = vmatprep.mubr.msk.f32.mxu1 %vm1173_vm1, %v1172_v5 }
  0xe4   :  { %1086 = vmatprep.subr.mxu1 %v1172_v5  ;;  %1093 = vmatprep.mubr.msk.f32.mxu0 %vm1173_vm1, %v1172_v5 }
  0xe5   :  { %1079 = vmatmul.mubr.f32.vlgmr.msra.gmra.mrb[6].mxu1 %v609_v22 }
  0xe6   :  { %1087 = vmatpush3.msra.mxu1 %v544_v28  ;;  %1088 = vmatprep.mubr.msk.f32.mxu1 %vm1173_vm1, %v1172_v5 }
  0xe7   :  { %1096 = vmatprep.subr.mxu1 %v1172_v5  ;;  %1094 = vmatmul.mubr.f32.vlgmr.msra.gmra.mrb[10].mxu0 %v609_v22 }
  0xe9   :  { %1089 = vmatmul.mubr.f32.vlgmr.msra.gmra.mrb[8].mxu1 %v611_v30 }
  0xea   :  { %1097 = vmatpush3.msra.mxu1 %v544_v28  ;;  %1098 = vmatprep.mubr.msk.f32.mxu1 %vm1173_vm1, %v1172_v5 }
  0xed   :  { %1099 = vmatmul.mubr.f32.vlgmr.msra.gmra.mrb[10].mxu1 %v609_v22 }
 0x1a4   :  { %v166_v39 = vpop.f32.mrb[0].mxu0 }
 0x1a5   :  { %v1045_v40 = vpop.f32.mrb[1].mxu0 }
 0x1a8   :  { %v316_v41 = vpop.f32.mrb[2].mxu0 }
 0x1a9   :  { %v1055_v42 = vpop.f32.mrb[3].mxu0 }
 0x1ac   :  { %v242_v43 = vpop.f32.mrb[0].mxu1 }
 0x1ad   :  { %v243_v44 = vadd.f32 %v242_v43, %v166_v39  ;;  %v1050_v45 = vpop.f32.mrb[1].mxu1  ;;  %v464_v46 = vpop.f32.mrb[4].mxu0 }
 0x1ae   :  { %v1065_v47 = vpop.f32.mrb[5].mxu0 }
 0x1af   :  { %v317_v48 = vadd.f32 %v316_v41, %v243_v44 }
 0x1b0   :  { %v390_v49 = vpop.f32.mrb[2].mxu1 }
 0x1b1   :  { %v391_v50 = vadd.f32 %v390_v49, %v317_v48  ;;  %v1060_v51 = vpop.f32.mrb[3].mxu1  ;;  %v615_v52 = vpop.f32.mrb[6].mxu0 }
 0x1b2   :  { %v1075_v53 = vpop.f32.mrb[7].mxu0 }
 0x1b3   :  { %v465_v54 = vadd.f32 %v464_v46, %v391_v50 }
 0x1b4   :  { %v536_v55 = vpop.f32.mrb[4].mxu1 }
 0x1b5   :  { %v537_v56 = vadd.f32 %v536_v55, %v465_v54  ;;  %v1070_v57 = vpop.f32.mrb[5].mxu1  ;;  %v765_v58 = vpop.f32.mrb[8].mxu0 }
 0x1b6   :  { %v1085_v59 = vpop.f32.mrb[9].mxu0 }
 0x1b7   :  { %v616_v60 = vadd.f32 %v615_v52, %v537_v56 }
 0x1b8   :  { %v691_v61 = vpop.f32.mrb[6].mxu1 }
 0x1b9   :  { %v692_v62 = vadd.f32 %v691_v61, %v616_v60  ;;  %v1080_v63 = vpop.f32.mrb[7].mxu1 }
 0x1ba   :  { %v913_v0 = vpop.f32.mrb[10].mxu0 }
 0x1bb   :  { %v766_v1 = vadd.f32 %v765_v58, %v692_v62  ;;  %v1095_v2 = vpop.f32.mrb[11].mxu0 }
 0x1bc   :  { %v839_v3 = vpop.f32.mrb[8].mxu1 }
 0x1bd   :  { %v840_v4 = vadd.f32 %v839_v3, %v766_v1  ;;  %v1090_v5 = vpop.f32.mrb[9].mxu1 }
 0x1bf   :  { %v914_v6 = vadd.f32 %v913_v0, %v840_v4 }
 0x1c0   :  { %v985_v8 = vpop.f32.mrb[10].mxu1 }
 0x1c1   :  { %v986_v9 = vadd.f32 %v985_v8, %v914_v6  ;;  %v1100_v10 = vpop.f32.mrb[11].mxu1 }
 0x1c3   :  { %v989_v11 = vadd.f32 %v986_v9, %v88_v7 }
 0x1c5   :  { %991 = vst.msk [vmem:[#allocation2] sm:$0x1] %vm67_vm5, %v989_v11 }
 0x1cc   :  { %v994_v12 = vld [vmem:[#allocation2] sm:$0x1] }
 0x1cd   :  { %1101 = vpush %v994_v12 }
 0x1fe   :  { %s1102_s2 = spop %1101 }
 0x1ff   :  { %998 = sst [smem:[#allocation8]] %s1102_s2 }
 0x200   :  { %1163 = shalt.err (!%p1160_p4)
}
 0x201   :  { %s1174_s16 = smov [#allocation8]  }
 0x202   :  { %1006 = dma.smem_to_hbm %s1174_s16, 16, %s1276_s3, [#allocation5]  }
 0x203   :  { %1168 = dma.done.wait [#allocation5], 16  }
 0x204   :  { %1169 = vsyncadd [#allocation5], 4294967280 }
 0x205   :  { %1010 = sfence }
 0x206   :  { %1011 = vsyncpa [#allocation4], 1 }
 0x207   :  { %1012 = vsyncpa [#allocation7], 1 }
 0x208   :  { %1013 = vsyncpa [#allocation5], 1 }

</bundles_post_ra>
